<compile_context>
chip_gen: v6e
topology: v6e:2x2x1
jax: 0.10.0
libtpu: 0.0.40
codegen_flags: <defaults>
</compile_context>

<pallas_src>
import functools

import jax
import jax.numpy as jnp
import numpy as np
from jax import lax
from jax.experimental import pallas as pl
from jax.experimental.pallas import tpu as pltpu

EPS = 1e-5


def _layernorm(x, w, b):
    # LayerNorm subclass computes in float32; x / w / b are f32 here.
    mu = jnp.mean(x, axis=-1, keepdims=True)
    var = jnp.mean((x - mu) ** 2, axis=-1, keepdims=True)
    return (x - mu) * lax.rsqrt(var + EPS) * w + b


def _quick_gelu(x):
    return x * jax.nn.sigmoid(1.702 * x)


def _block_kernel(x_ref, ln1w_ref, ln1b_ref, wqkv_ref, bqkv_ref,
                  wo_ref, bo_ref, ln2w_ref, ln2b_ref,
                  wfc_ref, bfc_ref, wpr_ref, bpr_ref,
                  o_ref, ctx_ref, *, n_head, seq_len):
    """One ResidualAttentionBlock for Bn sequences: block is (Bn, Lp, D) f32."""
    x = x_ref[...]                                 # (Bn, Lp, D) float32
    Bn, Lp, D = x.shape
    dh = D // n_head
    scale = 1.0 / float(dh) ** 0.5

    x2 = x.reshape(Bn * Lp, D)                     # Lp multiple of 8 -> layout-trivial

    # --- attention branch ---
    h = _layernorm(x2, ln1w_ref[...], ln1b_ref[...])
    qkv = jnp.dot(h.astype(jnp.bfloat16), wqkv_ref[...],
                  preferred_element_type=jnp.float32) + bqkv_ref[...]   # (Bn*Lp, 3D) f32
    qkv3 = qkv.reshape(Bn, Lp, 3 * D)
    q = qkv3[:, :, :D].astype(jnp.bfloat16)
    k = qkv3[:, :, D:2 * D].astype(jnp.bfloat16)
    v = qkv3[:, :, 2 * D:].astype(jnp.bfloat16)

    if Lp != seq_len:
        key_idx = lax.broadcasted_iota(jnp.int32, (1, 1, Lp), 2)
        key_mask = key_idx < seq_len               # mask out padded key positions
    else:
        key_mask = None

    for hh in range(n_head):
        sl = slice(hh * dh, (hh + 1) * dh)
        qh, kh, vh = q[:, :, sl], k[:, :, sl], v[:, :, sl]       # (Bn, Lp, dh)
        s = jnp.einsum('bld,bmd->blm', qh, kh,
                       preferred_element_type=jnp.float32) * scale   # (Bn, Lp, Lp) f32
        if key_mask is not None:
            s = jnp.where(key_mask, s, -1e30)
        s = s - jnp.max(s, axis=-1, keepdims=True)
        p = jnp.exp(s)
        p = p * pl.reciprocal(jnp.sum(p, axis=-1, keepdims=True), approx=True)
        # write head output straight into the ctx scratch slice (no concat)
        ctx_ref[:, :, sl] = jnp.einsum('blm,bmd->bld', p.astype(jnp.bfloat16), vh,
                                       preferred_element_type=jnp.float32)

    ctx = ctx_ref[...].reshape(Bn * Lp, D)
    attn_out = jnp.dot(ctx.astype(jnp.bfloat16), wo_ref[...],
                       preferred_element_type=jnp.float32) + bo_ref[...]
    x2 = x2 + attn_out

    # --- MLP branch ---
    h2 = _layernorm(x2, ln2w_ref[...], ln2b_ref[...])
    y = jnp.dot(h2.astype(jnp.bfloat16), wfc_ref[...],
                preferred_element_type=jnp.float32) + bfc_ref[...]      # (Bn*Lp, 4D) f32
    y = _quick_gelu(y)                                                  # f32 elementwise
    y = jnp.dot(y.astype(jnp.bfloat16), wpr_ref[...],
                preferred_element_type=jnp.float32) + bpr_ref[...]

    o_ref[...] = (x2 + y).reshape(Bn, Lp, D)


def residual_block_apply(x_nld, p, n_head, seq_len, Bn):
    """x_nld: (Np, Lp, D) float32; Np % Bn == 0, Lp % 8 == 0."""
    Np, Lp, D = x_nld.shape
    kernel = functools.partial(_block_kernel, n_head=n_head, seq_len=seq_len)

    def _bf16(a):
        return a.astype(jnp.bfloat16)

    # Matmul weights in bf16 (MXU fast path, half the VMEM residency);
    # biases and LayerNorm params stay f32.
    weight_args = [p["ln1_w"], p["ln1_b"], _bf16(p["wqkv_t"]), p["bqkv"],
                   _bf16(p["wo_t"]), p["bo"], p["ln2_w"], p["ln2_b"],
                   _bf16(p["wfc_t"]), p["bfc"], _bf16(p["wpr_t"]), p["bpr"]]

    def full_spec(a):
        nd = a.ndim
        return pl.BlockSpec(a.shape, lambda n, _nd=nd: (0,) * _nd)

    x_spec = pl.BlockSpec((Bn, Lp, D), lambda n: (n, 0, 0))
    in_specs = [x_spec] + [full_spec(a) for a in weight_args]

    # Explicit scoped-VMEM budget: bf16 weights (double-buffered) + f32 activations.
    w_bytes = 12 * D * D * 2
    a_bytes = 4 * Bn * Lp * (2 * D + 3 * D + 4 * D + 4 * D)
    vmem_limit = int(min(max(2 * w_bytes + 2 * a_bytes + (8 << 20), 32 << 20), 64 << 20))

    return pl.pallas_call(
        kernel,
        out_shape=jax.ShapeDtypeStruct((Np, Lp, D), jnp.float32),
        grid_spec=pltpu.PrefetchScalarGridSpec(
            num_scalar_prefetch=0,
            grid=(Np // Bn,),
            in_specs=in_specs,
            out_specs=x_spec,
            scratch_shapes=[pltpu.VMEM((Bn, Lp, D), jnp.float32)],
        ),
        input_output_aliases={0: 0},
        compiler_params=pltpu.CompilerParams(
            dimension_semantics=("parallel",),
            vmem_limit_bytes=vmem_limit),
    )(x_nld, *weight_args)


@functools.partial(jax.jit, static_argnums=(2,))
def transformer_forward(x_lnd, layer_params, n_head):
    """x_lnd: (L, N, D) like PyTorch CLIP Transformer; returns (L, N, D)."""
    L, N, D = x_lnd.shape
    x = jnp.transpose(x_lnd, (1, 0, 2)).astype(jnp.float32)   # (N, L, D)

    # Pad seq to a multiple of 8 (sublane) so in-kernel reshapes are layout-trivial.
    Lp = ((L + 7) // 8) * 8
    if Lp != L:
        x = jnp.pad(x, ((0, 0), (0, Lp - L), (0, 0)))

    # Batch Bn sequences per grid step (target ~512 matmul rows), pad N to match.
    Bn = max(1, min(N, pl.cdiv(512, Lp)))
    Np = ((N + Bn - 1) // Bn) * Bn
    if Np != N:
        x = jnp.pad(x, ((0, Np - N), (0, 0), (0, 0)))

    for p in layer_params:
        x = residual_block_apply(x, p, n_head, L, Bn)

    x = x[:N, :L]
    return jnp.transpose(x, (1, 0, 2))


# ----------------- deterministic parameter init (synthetic) -----------------
def init_block_params(key, D):
    ks = jax.random.split(key, 4)

    def tn(k, shape):                      # trunc_normal_(std=0.02) stand-in
        return 0.02 * jax.random.normal(k, shape, jnp.float32)

    wqkv = tn(ks[0], (3 * D, D))           # in_proj_weight
    wo = tn(ks[1], (D, D))                 # out_proj.weight
    wfc = tn(ks[2], (4 * D, D))            # mlp.c_fc.weight
    wpr = tn(ks[3], (D, 4 * D))            # mlp.c_proj.weight
    return dict(
        ln1_w=jnp.ones((1, D), jnp.float32), ln1_b=jnp.zeros((1, D), jnp.float32),
        wqkv_t=wqkv.T, bqkv=jnp.zeros((1, 3 * D), jnp.float32),
        wo_t=wo.T, bo=jnp.zeros((1, D), jnp.float32),
        ln2_w=jnp.ones((1, D), jnp.float32), ln2_b=jnp.zeros((1, D), jnp.float32),
        wfc_t=wfc.T, bfc=jnp.zeros((1, 4 * D), jnp.float32),
        wpr_t=wpr.T, bpr=jnp.zeros((1, D), jnp.float32),
    )


# ----------------------------- pure-JAX reference ---------------------------
def _ref_block(x, p, n_head):              # x: (N, L, D) f32, full-precision path
    D = x.shape[-1]
    dh = D // n_head

    def ln(v, w, b):
        mu = jnp.mean(v, -1, keepdims=True)
        var = jnp.mean((v - mu) ** 2, -1, keepdims=True)
        return (v - mu) / jnp.sqrt(var + EPS) * w + b

    h = ln(x, p["ln1_w"], p["ln1_b"])
    qkv = h @ p["wqkv_t"] + p["bqkv"]
    q, k, v = qkv[..., :D], qkv[..., D:2 * D], qkv[..., 2 * D:]

    def split(t):
        N, L, _ = t.shape
        return t.reshape(N, L, n_head, dh).transpose(0, 2, 1, 3)  # (N, H, L, dh)

    qh, kh, vh = split(q), split(k), split(v)
    s = jnp.einsum("nhld,nhmd->nhlm", qh, kh) / jnp.sqrt(dh)
    p_attn = jax.nn.softmax(s, axis=-1)
    ctx = jnp.einsum("nhlm,nhmd->nhld", p_attn, vh)
    ctx = ctx.transpose(0, 2, 1, 3).reshape(x.shape)
    x = x + (ctx @ p["wo_t"] + p["bo"])

    h2 = ln(x, p["ln2_w"], p["ln2_b"])
    y = h2 @ p["wfc_t"] + p["bfc"]
    y = y * jax.nn.sigmoid(1.702 * y)
    y = y @ p["wpr_t"] + p["bpr"]
    return x + y


def _ref_transformer(x_lnd, layer_params, n_head):
    x = jnp.transpose(x_lnd, (1, 0, 2)).astype(jnp.float32)
    for p in layer_params:
        x = _ref_block(x, p, n_head)
    return jnp.transpose(x, (1, 0, 2))


if __name__ == "__main__":
    # Small, module-consistent shapes: width=32, layers=2, heads=4, seq=8, batch=2.
    WIDTH, LAYERS, HEADS = 32, 2, 4
    L, N = 8, 2

    key = jax.random.PRNGKey(0)
    k_x, *k_layers = jax.random.split(key, LAYERS + 1)

    x = jax.random.normal(k_x, (L, N, WIDTH), jnp.float32)   # (seq, batch, d_model)
    params = [init_block_params(k, WIDTH) for k in k_layers]

    out = transformer_forward(x, params, HEADS)
    out = jax.block_until_ready(out)

    ref = jax.block_until_ready(_ref_transformer(x, params, HEADS))
    # Kernel runs matmuls in bf16 (f32 accumulation); reference is pure f32.
    np.testing.assert_allclose(np.asarray(out), np.asarray(ref), atol=2e-2, rtol=2e-2)

    assert out.shape == (L, N, WIDTH) and out.dtype == jnp.float32
    print("KERNEL_OK")
</pallas_src>

<mosaic_0001>
module attributes {stable_mosaic.version = 11 : i64} {
  func.func @_block_kernel(%arg0: i32, %arg1: memref<2x8x32xf32, #tpu.memory_space<vmem>>, %arg2: memref<1x32xf32, #tpu.memory_space<vmem>>, %arg3: memref<1x32xf32, #tpu.memory_space<vmem>>, %arg4: memref<32x96xbf16, #tpu.memory_space<vmem>>, %arg5: memref<1x96xf32, #tpu.memory_space<vmem>>, %arg6: memref<32x32xbf16, #tpu.memory_space<vmem>>, %arg7: memref<1x32xf32, #tpu.memory_space<vmem>>, %arg8: memref<1x32xf32, #tpu.memory_space<vmem>>, %arg9: memref<1x32xf32, #tpu.memory_space<vmem>>, %arg10: memref<32x128xbf16, #tpu.memory_space<vmem>>, %arg11: memref<1x128xf32, #tpu.memory_space<vmem>>, %arg12: memref<128x32xbf16, #tpu.memory_space<vmem>>, %arg13: memref<1x32xf32, #tpu.memory_space<vmem>>, %arg14: memref<2x8x32xf32, #tpu.memory_space<vmem>>, %arg15: memref<2x8x32xf32, #tpu.memory_space<vmem>>) attributes {dimension_semantics = [#tpu.dimension_semantics<parallel>], iteration_bounds = array<i64: 1>, scalar_prefetch = 0 : i64, scratch_operands = 1 : i64, tpu.core_type = #tpu.core_type<tc>, window_params = [{transform_indices = @transform_0, window_bounds = array<i64: 2, 8, 32>}, {pipeline_mode = #tpu.pipeline_mode<synchronous>, transform_indices = @transform_1, window_bounds = array<i64: 1, 32>}, {pipeline_mode = #tpu.pipeline_mode<synchronous>, transform_indices = @transform_2, window_bounds = array<i64: 1, 32>}, {pipeline_mode = #tpu.pipeline_mode<synchronous>, transform_indices = @transform_3, window_bounds = array<i64: 32, 96>}, {pipeline_mode = #tpu.pipeline_mode<synchronous>, transform_indices = @transform_4, window_bounds = array<i64: 1, 96>}, {pipeline_mode = #tpu.pipeline_mode<synchronous>, transform_indices = @transform_5, window_bounds = array<i64: 32, 32>}, {pipeline_mode = #tpu.pipeline_mode<synchronous>, transform_indices = @transform_6, window_bounds = array<i64: 1, 32>}, {pipeline_mode = #tpu.pipeline_mode<synchronous>, transform_indices = @transform_7, window_bounds = array<i64: 1, 32>}, {pipeline_mode = #tpu.pipeline_mode<synchronous>, transform_indices = @transform_8, window_bounds = array<i64: 1, 32>}, {pipeline_mode = #tpu.pipeline_mode<synchronous>, transform_indices = @transform_9, window_bounds = array<i64: 32, 128>}, {pipeline_mode = #tpu.pipeline_mode<synchronous>, transform_indices = @transform_10, window_bounds = array<i64: 1, 128>}, {pipeline_mode = #tpu.pipeline_mode<synchronous>, transform_indices = @transform_11, window_bounds = array<i64: 128, 32>}, {pipeline_mode = #tpu.pipeline_mode<synchronous>, transform_indices = @transform_12, window_bounds = array<i64: 1, 32>}, {transform_indices = @transform_13, window_bounds = array<i64: 2, 8, 32>}]} {
    %c0 = arith.constant 0 : index
    %c0_0 = arith.constant 0 : index
    %c0_1 = arith.constant 0 : index
    %0 = vector.load %arg1[%c0, %c0_0, %c0_1] : memref<2x8x32xf32, #tpu.memory_space<vmem>>, vector<2x8x32xf32>
    %1 = vector.shape_cast %0 : vector<2x8x32xf32> to vector<16x32xf32>
    %c0_2 = arith.constant 0 : index
    %c0_3 = arith.constant 0 : index
    %2 = vector.load %arg2[%c0_2, %c0_3] : memref<1x32xf32, #tpu.memory_space<vmem>>, vector<1x32xf32>
    %c0_4 = arith.constant 0 : index
    %c0_5 = arith.constant 0 : index
    %3 = vector.load %arg3[%c0_4, %c0_5] : memref<1x32xf32, #tpu.memory_space<vmem>>, vector<1x32xf32>
    %cst = arith.constant dense<0.000000e+00> : vector<16xf32>
    %4 = vector.multi_reduction <add>, %1, %cst [1] : vector<16x32xf32> to vector<16xf32>
    %5 = vector.shape_cast %4 : vector<16xf32> to vector<16x1xf32>
    %cst_6 = arith.constant 3.200000e+01 : f32
    %6 = vector.broadcast %cst_6 : f32 to vector<16x1xf32>
    %7 = arith.divf %5, %6 : vector<16x1xf32>
    %8 = vector.broadcast %7 : vector<16x1xf32> to vector<16x32xf32>
    %9 = arith.subf %1, %8 : vector<16x32xf32>
    %10 = arith.mulf %9, %9 : vector<16x32xf32>
    %cst_7 = arith.constant dense<0.000000e+00> : vector<16xf32>
    %11 = vector.multi_reduction <add>, %10, %cst_7 [1] : vector<16x32xf32> to vector<16xf32>
    %12 = vector.shape_cast %11 : vector<16xf32> to vector<16x1xf32>
    %cst_8 = arith.constant 3.200000e+01 : f32
    %13 = vector.broadcast %cst_8 : f32 to vector<16x1xf32>
    %14 = arith.divf %12, %13 : vector<16x1xf32>
    %15 = vector.broadcast %7 : vector<16x1xf32> to vector<16x32xf32>
    %16 = arith.subf %1, %15 : vector<16x32xf32>
    %cst_9 = arith.constant 9.99999974E-6 : f32
    %17 = vector.broadcast %cst_9 : f32 to vector<16x1xf32>
    %18 = arith.addf %14, %17 : vector<16x1xf32>
    %19 = math.rsqrt %18 : vector<16x1xf32>
    %20 = vector.broadcast %19 : vector<16x1xf32> to vector<16x32xf32>
    %21 = arith.mulf %16, %20 : vector<16x32xf32>
    %22 = vector.broadcast %2 : vector<1x32xf32> to vector<16x32xf32>
    %23 = arith.mulf %21, %22 : vector<16x32xf32>
    %24 = vector.broadcast %3 : vector<1x32xf32> to vector<16x32xf32>
    %25 = arith.addf %23, %24 : vector<16x32xf32>
    %26 = arith.truncf %25 : vector<16x32xf32> to vector<16x32xbf16>
    %c0_10 = arith.constant 0 : index
    %c0_11 = arith.constant 0 : index
    %27 = vector.load %arg4[%c0_10, %c0_11] : memref<32x96xbf16, #tpu.memory_space<vmem>>, vector<32x96xbf16>
    %cst_12 = arith.constant dense<0.000000e+00> : vector<16x96xf32>
    %28 = tpu.matmul %26, %27, %cst_12 {dimension_numbers = #tpu.dot_dimension_numbers<[1], [0], [0], [1], [0, 0, 1, 1], [], []>} : vector<16x32xbf16>, vector<32x96xbf16>, vector<16x96xf32> -> vector<16x96xf32>
    %c0_13 = arith.constant 0 : index
    %c0_14 = arith.constant 0 : index
    %29 = vector.load %arg5[%c0_13, %c0_14] : memref<1x96xf32, #tpu.memory_space<vmem>>, vector<1x96xf32>
    %30 = vector.broadcast %29 : vector<1x96xf32> to vector<16x96xf32>
    %31 = arith.addf %28, %30 : vector<16x96xf32>
    %32 = vector.shape_cast %31 : vector<16x96xf32> to vector<2x8x96xf32>
    %33 = vector.extract_strided_slice %32 {offsets = [0, 0, 0], sizes = [2, 8, 32], strides = [1, 1, 1]} : vector<2x8x96xf32> to vector<2x8x32xf32>
    %34 = arith.truncf %33 : vector<2x8x32xf32> to vector<2x8x32xbf16>
    %35 = vector.extract_strided_slice %32 {offsets = [0, 0, 32], sizes = [2, 8, 32], strides = [1, 1, 1]} : vector<2x8x96xf32> to vector<2x8x32xf32>
    %36 = arith.truncf %35 : vector<2x8x32xf32> to vector<2x8x32xbf16>
    %37 = vector.extract_strided_slice %32 {offsets = [0, 0, 64], sizes = [2, 8, 32], strides = [1, 1, 1]} : vector<2x8x96xf32> to vector<2x8x32xf32>
    %38 = arith.truncf %37 : vector<2x8x32xf32> to vector<2x8x32xbf16>
    %39 = vector.extract_strided_slice %34 {offsets = [0, 0, 0], sizes = [2, 8, 8], strides = [1, 1, 1]} : vector<2x8x32xbf16> to vector<2x8x8xbf16>
    %40 = vector.extract_strided_slice %36 {offsets = [0, 0, 0], sizes = [2, 8, 8], strides = [1, 1, 1]} : vector<2x8x32xbf16> to vector<2x8x8xbf16>
    %41 = vector.extract_strided_slice %38 {offsets = [0, 0, 0], sizes = [2, 8, 8], strides = [1, 1, 1]} : vector<2x8x32xbf16> to vector<2x8x8xbf16>
    "tpu.trace_start"() <{level = 10 : i32, message = "bld,bmd->blm"}> : () -> ()
    %cst_15 = arith.constant dense<0.000000e+00> : vector<2x8x8xf32>
    %42 = tpu.matmul %39, %40, %cst_15 {dimension_numbers = #tpu.dot_dimension_numbers<[2], [2], [1], [1], [0, 0, 0, 1, 1, 1], [0], [0]>} : vector<2x8x8xbf16>, vector<2x8x8xbf16>, vector<2x8x8xf32> -> vector<2x8x8xf32>
    "tpu.trace_stop"() : () -> ()
    %cst_16 = arith.constant 0.353553385 : f32
    %43 = vector.broadcast %cst_16 : f32 to vector<2x8x8xf32>
    %44 = arith.mulf %42, %43 : vector<2x8x8xf32>
    %cst_17 = arith.constant dense<0xFF800000> : vector<2x8xf32>
    %45 = vector.multi_reduction <maximumf>, %44, %cst_17 [2] : vector<2x8x8xf32> to vector<2x8xf32>
    %46 = vector.shape_cast %45 : vector<2x8xf32> to vector<2x8x1xf32>
    %47 = vector.broadcast %46 : vector<2x8x1xf32> to vector<2x8x8xf32>
    %48 = arith.subf %44, %47 : vector<2x8x8xf32>
    %49 = math.exp %48 : vector<2x8x8xf32>
    %cst_18 = arith.constant dense<0.000000e+00> : vector<2x8xf32>
    %50 = vector.multi_reduction <add>, %49, %cst_18 [2] : vector<2x8x8xf32> to vector<2x8xf32>
    %51 = vector.shape_cast %50 : vector<2x8xf32> to vector<2x8x1xf32>
    %52 = tpu.reciprocal %51 {approx = true} : vector<2x8x1xf32> -> vector<2x8x1xf32>
    %53 = vector.broadcast %52 : vector<2x8x1xf32> to vector<2x8x8xf32>
    %54 = arith.mulf %49, %53 : vector<2x8x8xf32>
    %55 = arith.truncf %54 : vector<2x8x8xf32> to vector<2x8x8xbf16>
    "tpu.trace_start"() <{level = 10 : i32, message = "blm,bmd->bld"}> : () -> ()
    %cst_19 = arith.constant dense<0.000000e+00> : vector<2x8x8xf32>
    %56 = tpu.matmul %55, %41, %cst_19 {dimension_numbers = #tpu.dot_dimension_numbers<[2], [1], [1], [2], [0, 0, 0, 1, 1, 2], [0], [0]>} : vector<2x8x8xbf16>, vector<2x8x8xbf16>, vector<2x8x8xf32> -> vector<2x8x8xf32>
    "tpu.trace_stop"() : () -> ()
    %c0_20 = arith.constant 0 : index
    %c0_21 = arith.constant 0 : index
    %c0_22 = arith.constant 0 : index
    %57 = vector.load %arg15[%c0_20, %c0_21, %c0_22] : memref<2x8x32xf32, #tpu.memory_space<vmem>>, vector<2x8x8xf32>
    tpu.vector_store %arg15[%c0_20, %c0_21, %c0_22], %56 {strides = array<i32>} : memref<2x8x32xf32, #tpu.memory_space<vmem>>, vector<2x8x8xf32>,
    %58 = vector.extract_strided_slice %34 {offsets = [0, 0, 8], sizes = [2, 8, 8], strides = [1, 1, 1]} : vector<2x8x32xbf16> to vector<2x8x8xbf16>
    %59 = vector.extract_strided_slice %36 {offsets = [0, 0, 8], sizes = [2, 8, 8], strides = [1, 1, 1]} : vector<2x8x32xbf16> to vector<2x8x8xbf16>
    %60 = vector.extract_strided_slice %38 {offsets = [0, 0, 8], sizes = [2, 8, 8], strides = [1, 1, 1]} : vector<2x8x32xbf16> to vector<2x8x8xbf16>
    "tpu.trace_start"() <{level = 10 : i32, message = "bld,bmd->blm"}> : () -> ()
    %cst_23 = arith.constant dense<0.000000e+00> : vector<2x8x8xf32>
    %61 = tpu.matmul %58, %59, %cst_23 {dimension_numbers = #tpu.dot_dimension_numbers<[2], [2], [1], [1], [0, 0, 0, 1, 1, 1], [0], [0]>} : vector<2x8x8xbf16>, vector<2x8x8xbf16>, vector<2x8x8xf32> -> vector<2x8x8xf32>
    "tpu.trace_stop"() : () -> ()
    %cst_24 = arith.constant 0.353553385 : f32
    %62 = vector.broadcast %cst_24 : f32 to vector<2x8x8xf32>
    %63 = arith.mulf %61, %62 : vector<2x8x8xf32>
    %cst_25 = arith.constant dense<0xFF800000> : vector<2x8xf32>
    %64 = vector.multi_reduction <maximumf>, %63, %cst_25 [2] : vector<2x8x8xf32> to vector<2x8xf32>
    %65 = vector.shape_cast %64 : vector<2x8xf32> to vector<2x8x1xf32>
    %66 = vector.broadcast %65 : vector<2x8x1xf32> to vector<2x8x8xf32>
    %67 = arith.subf %63, %66 : vector<2x8x8xf32>
    %68 = math.exp %67 : vector<2x8x8xf32>
    %cst_26 = arith.constant dense<0.000000e+00> : vector<2x8xf32>
    %69 = vector.multi_reduction <add>, %68, %cst_26 [2] : vector<2x8x8xf32> to vector<2x8xf32>
    %70 = vector.shape_cast %69 : vector<2x8xf32> to vector<2x8x1xf32>
    %71 = tpu.reciprocal %70 {approx = true} : vector<2x8x1xf32> -> vector<2x8x1xf32>
    %72 = vector.broadcast %71 : vector<2x8x1xf32> to vector<2x8x8xf32>
    %73 = arith.mulf %68, %72 : vector<2x8x8xf32>
    %74 = arith.truncf %73 : vector<2x8x8xf32> to vector<2x8x8xbf16>
    "tpu.trace_start"() <{level = 10 : i32, message = "blm,bmd->bld"}> : () -> ()
    %cst_27 = arith.constant dense<0.000000e+00> : vector<2x8x8xf32>
    %75 = tpu.matmul %74, %60, %cst_27 {dimension_numbers = #tpu.dot_dimension_numbers<[2], [1], [1], [2], [0, 0, 0, 1, 1, 2], [0], [0]>} : vector<2x8x8xbf16>, vector<2x8x8xbf16>, vector<2x8x8xf32> -> vector<2x8x8xf32>
    "tpu.trace_stop"() : () -> ()
    %c0_28 = arith.constant 0 : index
    %c0_29 = arith.constant 0 : index
    %c8 = arith.constant 8 : index
    %76 = vector.load %arg15[%c0_28, %c0_29, %c8] : memref<2x8x32xf32, #tpu.memory_space<vmem>>, vector<2x8x8xf32>
    tpu.vector_store %arg15[%c0_28, %c0_29, %c8], %75 {strides = array<i32>} : memref<2x8x32xf32, #tpu.memory_space<vmem>>, vector<2x8x8xf32>,
    %77 = vector.extract_strided_slice %34 {offsets = [0, 0, 16], sizes = [2, 8, 8], strides = [1, 1, 1]} : vector<2x8x32xbf16> to vector<2x8x8xbf16>
    %78 = vector.extract_strided_slice %36 {offsets = [0, 0, 16], sizes = [2, 8, 8], strides = [1, 1, 1]} : vector<2x8x32xbf16> to vector<2x8x8xbf16>
    %79 = vector.extract_strided_slice %38 {offsets = [0, 0, 16], sizes = [2, 8, 8], strides = [1, 1, 1]} : vector<2x8x32xbf16> to vector<2x8x8xbf16>
    "tpu.trace_start"() <{level = 10 : i32, message = "bld,bmd->blm"}> : () -> ()
    %cst_30 = arith.constant dense<0.000000e+00> : vector<2x8x8xf32>
    %80 = tpu.matmul %77, %78, %cst_30 {dimension_numbers = #tpu.dot_dimension_numbers<[2], [2], [1], [1], [0, 0, 0, 1, 1, 1], [0], [0]>} : vector<2x8x8xbf16>, vector<2x8x8xbf16>, vector<2x8x8xf32> -> vector<2x8x8xf32>
    "tpu.trace_stop"() : () -> ()
    %cst_31 = arith.constant 0.353553385 : f32
    %81 = vector.broadcast %cst_31 : f32 to vector<2x8x8xf32>
    %82 = arith.mulf %80, %81 : vector<2x8x8xf32>
    %cst_32 = arith.constant dense<0xFF800000> : vector<2x8xf32>
    %83 = vector.multi_reduction <maximumf>, %82, %cst_32 [2] : vector<2x8x8xf32> to vector<2x8xf32>
    %84 = vector.shape_cast %83 : vector<2x8xf32> to vector<2x8x1xf32>
    %85 = vector.broadcast %84 : vector<2x8x1xf32> to vector<2x8x8xf32>
    %86 = arith.subf %82, %85 : vector<2x8x8xf32>
    %87 = math.exp %86 : vector<2x8x8xf32>
    %cst_33 = arith.constant dense<0.000000e+00> : vector<2x8xf32>
    %88 = vector.multi_reduction <add>, %87, %cst_33 [2] : vector<2x8x8xf32> to vector<2x8xf32>
    %89 = vector.shape_cast %88 : vector<2x8xf32> to vector<2x8x1xf32>
    %90 = tpu.reciprocal %89 {approx = true} : vector<2x8x1xf32> -> vector<2x8x1xf32>
    %91 = vector.broadcast %90 : vector<2x8x1xf32> to vector<2x8x8xf32>
    %92 = arith.mulf %87, %91 : vector<2x8x8xf32>
    %93 = arith.truncf %92 : vector<2x8x8xf32> to vector<2x8x8xbf16>
    "tpu.trace_start"() <{level = 10 : i32, message = "blm,bmd->bld"}> : () -> ()
    %cst_34 = arith.constant dense<0.000000e+00> : vector<2x8x8xf32>
    %94 = tpu.matmul %93, %79, %cst_34 {dimension_numbers = #tpu.dot_dimension_numbers<[2], [1], [1], [2], [0, 0, 0, 1, 1, 2], [0], [0]>} : vector<2x8x8xbf16>, vector<2x8x8xbf16>, vector<2x8x8xf32> -> vector<2x8x8xf32>
    "tpu.trace_stop"() : () -> ()
    %c0_35 = arith.constant 0 : index
    %c0_36 = arith.constant 0 : index
    %c16 = arith.constant 16 : index
    %95 = vector.load %arg15[%c0_35, %c0_36, %c16] : memref<2x8x32xf32, #tpu.memory_space<vmem>>, vector<2x8x8xf32>
    tpu.vector_store %arg15[%c0_35, %c0_36, %c16], %94 {strides = array<i32>} : memref<2x8x32xf32, #tpu.memory_space<vmem>>, vector<2x8x8xf32>,
    %96 = vector.extract_strided_slice %34 {offsets = [0, 0, 24], sizes = [2, 8, 8], strides = [1, 1, 1]} : vector<2x8x32xbf16> to vector<2x8x8xbf16>
    %97 = vector.extract_strided_slice %36 {offsets = [0, 0, 24], sizes = [2, 8, 8], strides = [1, 1, 1]} : vector<2x8x32xbf16> to vector<2x8x8xbf16>
    %98 = vector.extract_strided_slice %38 {offsets = [0, 0, 24], sizes = [2, 8, 8], strides = [1, 1, 1]} : vector<2x8x32xbf16> to vector<2x8x8xbf16>
    "tpu.trace_start"() <{level = 10 : i32, message = "bld,bmd->blm"}> : () -> ()
    %cst_37 = arith.constant dense<0.000000e+00> : vector<2x8x8xf32>
    %99 = tpu.matmul %96, %97, %cst_37 {dimension_numbers = #tpu.dot_dimension_numbers<[2], [2], [1], [1], [0, 0, 0, 1, 1, 1], [0], [0]>} : vector<2x8x8xbf16>, vector<2x8x8xbf16>, vector<2x8x8xf32> -> vector<2x8x8xf32>
    "tpu.trace_stop"() : () -> ()
    %cst_38 = arith.constant 0.353553385 : f32
    %100 = vector.broadcast %cst_38 : f32 to vector<2x8x8xf32>
    %101 = arith.mulf %99, %100 : vector<2x8x8xf32>
    %cst_39 = arith.constant dense<0xFF800000> : vector<2x8xf32>
    %102 = vector.multi_reduction <maximumf>, %101, %cst_39 [2] : vector<2x8x8xf32> to vector<2x8xf32>
    %103 = vector.shape_cast %102 : vector<2x8xf32> to vector<2x8x1xf32>
    %104 = vector.broadcast %103 : vector<2x8x1xf32> to vector<2x8x8xf32>
    %105 = arith.subf %101, %104 : vector<2x8x8xf32>
    %106 = math.exp %105 : vector<2x8x8xf32>
    %cst_40 = arith.constant dense<0.000000e+00> : vector<2x8xf32>
    %107 = vector.multi_reduction <add>, %106, %cst_40 [2] : vector<2x8x8xf32> to vector<2x8xf32>
    %108 = vector.shape_cast %107 : vector<2x8xf32> to vector<2x8x1xf32>
    %109 = tpu.reciprocal %108 {approx = true} : vector<2x8x1xf32> -> vector<2x8x1xf32>
    %110 = vector.broadcast %109 : vector<2x8x1xf32> to vector<2x8x8xf32>
    %111 = arith.mulf %106, %110 : vector<2x8x8xf32>
    %112 = arith.truncf %111 : vector<2x8x8xf32> to vector<2x8x8xbf16>
    "tpu.trace_start"() <{level = 10 : i32, message = "blm,bmd->bld"}> : () -> ()
    %cst_41 = arith.constant dense<0.000000e+00> : vector<2x8x8xf32>
    %113 = tpu.matmul %112, %98, %cst_41 {dimension_numbers = #tpu.dot_dimension_numbers<[2], [1], [1], [2], [0, 0, 0, 1, 1, 2], [0], [0]>} : vector<2x8x8xbf16>, vector<2x8x8xbf16>, vector<2x8x8xf32> -> vector<2x8x8xf32>
    "tpu.trace_stop"() : () -> ()
    %c0_42 = arith.constant 0 : index
    %c0_43 = arith.constant 0 : index
    %c24 = arith.constant 24 : index
    %114 = vector.load %arg15[%c0_42, %c0_43, %c24] : memref<2x8x32xf32, #tpu.memory_space<vmem>>, vector<2x8x8xf32>
    tpu.vector_store %arg15[%c0_42, %c0_43, %c24], %113 {strides = array<i32>} : memref<2x8x32xf32, #tpu.memory_space<vmem>>, vector<2x8x8xf32>,
    %c0_44 = arith.constant 0 : index
    %c0_45 = arith.constant 0 : index
    %c0_46 = arith.constant 0 : index
    %115 = vector.load %arg15[%c0_44, %c0_45, %c0_46] : memref<2x8x32xf32, #tpu.memory_space<vmem>>, vector<2x8x32xf32>
    %116 = vector.shape_cast %115 : vector<2x8x32xf32> to vector<16x32xf32>
    %117 = arith.truncf %116 : vector<16x32xf32> to vector<16x32xbf16>
    %c0_47 = arith.constant 0 : index
    %c0_48 = arith.constant 0 : index
    %118 = vector.load %arg6[%c0_47, %c0_48] : memref<32x32xbf16, #tpu.memory_space<vmem>>, vector<32x32xbf16>
    %cst_49 = arith.constant dense<0.000000e+00> : vector<16x32xf32>
    %119 = tpu.matmul %117, %118, %cst_49 {dimension_numbers = #tpu.dot_dimension_numbers<[1], [0], [0], [1], [0, 0, 1, 1], [], []>} : vector<16x32xbf16>, vector<32x32xbf16>, vector<16x32xf32> -> vector<16x32xf32>
    %c0_50 = arith.constant 0 : index
    %c0_51 = arith.constant 0 : index
    %120 = vector.load %arg7[%c0_50, %c0_51] : memref<1x32xf32, #tpu.memory_space<vmem>>, vector<1x32xf32>
    %121 = vector.broadcast %120 : vector<1x32xf32> to vector<16x32xf32>
    %122 = arith.addf %119, %121 : vector<16x32xf32>
    %123 = arith.addf %1, %122 : vector<16x32xf32>
    %c0_52 = arith.constant 0 : index
    %c0_53 = arith.constant 0 : index
    %124 = vector.load %arg8[%c0_52, %c0_53] : memref<1x32xf32, #tpu.memory_space<vmem>>, vector<1x32xf32>
    %c0_54 = arith.constant 0 : index
    %c0_55 = arith.constant 0 : index
    %125 = vector.load %arg9[%c0_54, %c0_55] : memref<1x32xf32, #tpu.memory_space<vmem>>, vector<1x32xf32>
    %cst_56 = arith.constant dense<0.000000e+00> : vector<16xf32>
    %126 = vector.multi_reduction <add>, %123, %cst_56 [1] : vector<16x32xf32> to vector<16xf32>
    %127 = vector.shape_cast %126 : vector<16xf32> to vector<16x1xf32>
    %cst_57 = arith.constant 3.200000e+01 : f32
    %128 = vector.broadcast %cst_57 : f32 to vector<16x1xf32>
    %129 = arith.divf %127, %128 : vector<16x1xf32>
    %130 = vector.broadcast %129 : vector<16x1xf32> to vector<16x32xf32>
    %131 = arith.subf %123, %130 : vector<16x32xf32>
    %132 = arith.mulf %131, %131 : vector<16x32xf32>
    %cst_58 = arith.constant dense<0.000000e+00> : vector<16xf32>
    %133 = vector.multi_reduction <add>, %132, %cst_58 [1] : vector<16x32xf32> to vector<16xf32>
    %134 = vector.shape_cast %133 : vector<16xf32> to vector<16x1xf32>
    %cst_59 = arith.constant 3.200000e+01 : f32
    %135 = vector.broadcast %cst_59 : f32 to vector<16x1xf32>
    %136 = arith.divf %134, %135 : vector<16x1xf32>
    %137 = vector.broadcast %129 : vector<16x1xf32> to vector<16x32xf32>
    %138 = arith.subf %123, %137 : vector<16x32xf32>
    %cst_60 = arith.constant 9.99999974E-6 : f32
    %139 = vector.broadcast %cst_60 : f32 to vector<16x1xf32>
    %140 = arith.addf %136, %139 : vector<16x1xf32>
    %141 = math.rsqrt %140 : vector<16x1xf32>
    %142 = vector.broadcast %141 : vector<16x1xf32> to vector<16x32xf32>
    %143 = arith.mulf %138, %142 : vector<16x32xf32>
    %144 = vector.broadcast %124 : vector<1x32xf32> to vector<16x32xf32>
    %145 = arith.mulf %143, %144 : vector<16x32xf32>
    %146 = vector.broadcast %125 : vector<1x32xf32> to vector<16x32xf32>
    %147 = arith.addf %145, %146 : vector<16x32xf32>
    %148 = arith.truncf %147 : vector<16x32xf32> to vector<16x32xbf16>
    %c0_61 = arith.constant 0 : index
    %c0_62 = arith.constant 0 : index
    %149 = vector.load %arg10[%c0_61, %c0_62] : memref<32x128xbf16, #tpu.memory_space<vmem>>, vector<32x128xbf16>
    %cst_63 = arith.constant dense<0.000000e+00> : vector<16x128xf32>
    %150 = tpu.matmul %148, %149, %cst_63 {dimension_numbers = #tpu.dot_dimension_numbers<[1], [0], [0], [1], [0, 0, 1, 1], [], []>} : vector<16x32xbf16>, vector<32x128xbf16>, vector<16x128xf32> -> vector<16x128xf32>
    %c0_64 = arith.constant 0 : index
    %c0_65 = arith.constant 0 : index
    %151 = vector.load %arg11[%c0_64, %c0_65] : memref<1x128xf32, #tpu.memory_space<vmem>>, vector<1x128xf32>
    %152 = vector.broadcast %151 : vector<1x128xf32> to vector<16x128xf32>
    %153 = arith.addf %150, %152 : vector<16x128xf32>
    %cst_66 = arith.constant 1.702000e+00 : f32
    %154 = vector.broadcast %cst_66 : f32 to vector<16x128xf32>
    %155 = arith.mulf %154, %153 : vector<16x128xf32>
    %156 = arith.negf %155 : vector<16x128xf32>
    %157 = math.exp %156 : vector<16x128xf32>
    %cst_67 = arith.constant 1.000000e+00 : f32
    %158 = vector.broadcast %cst_67 : f32 to vector<16x128xf32>
    %159 = arith.addf %158, %157 : vector<16x128xf32>
    %160 = arith.divf %158, %159 : vector<16x128xf32>
    %161 = arith.mulf %153, %160 : vector<16x128xf32>
    %162 = arith.truncf %161 : vector<16x128xf32> to vector<16x128xbf16>
    %c0_68 = arith.constant 0 : index
    %c0_69 = arith.constant 0 : index
    %163 = vector.load %arg12[%c0_68, %c0_69] : memref<128x32xbf16, #tpu.memory_space<vmem>>, vector<128x32xbf16>
    %cst_70 = arith.constant dense<0.000000e+00> : vector<16x32xf32>
    %164 = tpu.matmul %162, %163, %cst_70 {dimension_numbers = #tpu.dot_dimension_numbers<[1], [0], [0], [1], [0, 0, 1, 1], [], []>} : vector<16x128xbf16>, vector<128x32xbf16>, vector<16x32xf32> -> vector<16x32xf32>
    %c0_71 = arith.constant 0 : index
    %c0_72 = arith.constant 0 : index
    %165 = vector.load %arg13[%c0_71, %c0_72] : memref<1x32xf32, #tpu.memory_space<vmem>>, vector<1x32xf32>
    %166 = vector.broadcast %165 : vector<1x32xf32> to vector<16x32xf32>
    %167 = arith.addf %164, %166 : vector<16x32xf32>
    %168 = arith.addf %123, %167 : vector<16x32xf32>
    %169 = vector.shape_cast %168 : vector<16x32xf32> to vector<2x8x32xf32>
    %c0_73 = arith.constant 0 : index
    %c0_74 = arith.constant 0 : index
    %c0_75 = arith.constant 0 : index
    %170 = vector.load %arg14[%c0_73, %c0_74, %c0_75] : memref<2x8x32xf32, #tpu.memory_space<vmem>>, vector<2x8x32xf32>
    tpu.vector_store %arg14[%c0_73, %c0_74, %c0_75], %169 {strides = array<i32>} : memref<2x8x32xf32, #tpu.memory_space<vmem>>, vector<2x8x32xf32>,
    return
  }
  func.func @transform_0(%arg0: i32) -> (i32, i32, i32) {
    %c0_i32 = arith.constant 0 : i32
    %c0_i32_0 = arith.constant 0 : i32
    %c0_i32_1 = arith.constant 0 : i32
    return %arg0, %c0_i32, %c0_i32_0 : i32, i32, i32
  }
  func.func @transform_1(%arg0: i32) -> (i32, i32) {
    %c0_i32 = arith.constant 0 : i32
    %c0_i32_0 = arith.constant 0 : i32
    %c0_i32_1 = arith.constant 0 : i32
    return %c0_i32, %c0_i32_0 : i32, i32
  }
  func.func @transform_2(%arg0: i32) -> (i32, i32) {
    %c0_i32 = arith.constant 0 : i32
    %c0_i32_0 = arith.constant 0 : i32
    %c0_i32_1 = arith.constant 0 : i32
    return %c0_i32, %c0_i32_0 : i32, i32
  }
  func.func @transform_3(%arg0: i32) -> (i32, i32) {
    %c0_i32 = arith.constant 0 : i32
    %c0_i32_0 = arith.constant 0 : i32
    %c0_i32_1 = arith.constant 0 : i32
    return %c0_i32, %c0_i32_0 : i32, i32
  }
  func.func @transform_4(%arg0: i32) -> (i32, i32) {
    %c0_i32 = arith.constant 0 : i32
    %c0_i32_0 = arith.constant 0 : i32
    %c0_i32_1 = arith.constant 0 : i32
    return %c0_i32, %c0_i32_0 : i32, i32
  }
  func.func @transform_5(%arg0: i32) -> (i32, i32) {
    %c0_i32 = arith.constant 0 : i32
    %c0_i32_0 = arith.constant 0 : i32
    %c0_i32_1 = arith.constant 0 : i32
    return %c0_i32, %c0_i32_0 : i32, i32
  }
  func.func @transform_6(%arg0: i32) -> (i32, i32) {
    %c0_i32 = arith.constant 0 : i32
    %c0_i32_0 = arith.constant 0 : i32
    %c0_i32_1 = arith.constant 0 : i32
    return %c0_i32, %c0_i32_0 : i32, i32
  }
  func.func @transform_7(%arg0: i32) -> (i32, i32) {
    %c0_i32 = arith.constant 0 : i32
    %c0_i32_0 = arith.constant 0 : i32
    %c0_i32_1 = arith.constant 0 : i32
    return %c0_i32, %c0_i32_0 : i32, i32
  }
  func.func @transform_8(%arg0: i32) -> (i32, i32) {
    %c0_i32 = arith.constant 0 : i32
    %c0_i32_0 = arith.constant 0 : i32
    %c0_i32_1 = arith.constant 0 : i32
    return %c0_i32, %c0_i32_0 : i32, i32
  }
  func.func @transform_9(%arg0: i32) -> (i32, i32) {
    %c0_i32 = arith.constant 0 : i32
    %c0_i32_0 = arith.constant 0 : i32
    %c0_i32_1 = arith.constant 0 : i32
    return %c0_i32, %c0_i32_0 : i32, i32
  }
  func.func @transform_10(%arg0: i32) -> (i32, i32) {
    %c0_i32 = arith.constant 0 : i32
    %c0_i32_0 = arith.constant 0 : i32
    %c0_i32_1 = arith.constant 0 : i32
    return %c0_i32, %c0_i32_0 : i32, i32
  }
  func.func @transform_11(%arg0: i32) -> (i32, i32) {
    %c0_i32 = arith.constant 0 : i32
    %c0_i32_0 = arith.constant 0 : i32
    %c0_i32_1 = arith.constant 0 : i32
    return %c0_i32, %c0_i32_0 : i32, i32
  }
  func.func @transform_12(%arg0: i32) -> (i32, i32) {
    %c0_i32 = arith.constant 0 : i32
    %c0_i32_0 = arith.constant 0 : i32
    %c0_i32_1 = arith.constant 0 : i32
    return %c0_i32, %c0_i32_0 : i32, i32
  }
  func.func @transform_13(%arg0: i32) -> (i32, i32, i32) {
    %c0_i32 = arith.constant 0 : i32
    %c0_i32_0 = arith.constant 0 : i32
    %c0_i32_1 = arith.constant 0 : i32
    return %arg0, %c0_i32, %c0_i32_0 : i32, i32, i32
  }
}

</mosaic_0001>

<bundles_post_ra>
// kernel: transformer_forward.2
= control target key start
LH: loop header
LB: loop body
LE: loop exit
PB: predicated region body
PF: predicated region fallthrough
CT: control target
= control target key end

     0   :  { %vm49_vm0 = vcmask 261120   ;;  %v1718_v14 = vmov 0.0   ;;  %vm1719_vm1 = vmmov 0   ;;  %vm166_vm2 = vcmask 64512   ;;  %s1723_s20 = smov 120   ;;  %s1724_s21 = smov 56   ;;  %s2073_s0 = inlined_call_operand.vmem [shape: f32[2,8,32], index: 0, kind: input, shape index: {}, may-alias: {0,13}]   ;;  %s2074_s3 = inlined_call_operand.vmem [shape: bf16[32,96], index: 3, kind: input, shape index: {}]   ;;  %s2075_s1 = inlined_call_operand.vmem [shape: f32[1,32], index: 1, kind: input, shape index: {}]   ;;  %s2076_s2 = inlined_call_operand.vmem [shape: f32[1,32], index: 2, kind: input, shape index: {}]   ;;  %s2077_s4 = inlined_call_operand.vmem [shape: f32[1,96], index: 4, kind: input, shape index: {}]   ;;  %s2078_s5 = inlined_call_operand.vmem [shape: bf16[32,32], index: 5, kind: input, shape index: {}]   ;;  %s2079_s6 = inlined_call_operand.vmem [shape: f32[1,32], index: 6, kind: input, shape index: {}]   ;;  %s2080_s9 = inlined_call_operand.vmem [shape: bf16[32,128], index: 9, kind: input, shape index: {}]   ;;  %s2081_s7 = inlined_call_operand.vmem [shape: f32[1,32], index: 7, kind: input, shape index: {}]   ;;  %s2082_s8 = inlined_call_operand.vmem [shape: f32[1,32], index: 8, kind: input, shape index: {}]   ;;  %s2083_s11 = inlined_call_operand.vmem [shape: bf16[128,32], index: 11, kind: input, shape index: {}]   ;;  %s2084_s10 = inlined_call_operand.vmem [shape: f32[1,128], index: 10, kind: input, shape index: {}]   ;;  %s2085_s12 = inlined_call_operand.vmem [shape: f32[1,32], index: 12, kind: input, shape index: {}]   ;;  %s2086_s13 = inlined_call_operand.vmem [shape: f32[2,8,32], index: 13, kind: output, shape index: {}, may-alias: {0,13}]  }
   0x1   :  { %v1807_v0 = vld [vmem:[%s2073_s0] sm:$0xff]  ;;  %v1812_v1 = vld [vmem:[%s2073_s0 + $0x8] sm:$0xff]  ;;  %1500 = vmatprep.subr.bf16.mxu0 %v1718_v14  ;;  %1504 = vmatprep.mubr.msk.bf16.mxu0 %vm1719_vm1, %v1718_v14  ;;  %vm293_vm3 = vcmask 1043456   ;;  %s1725_s22 = smov 80   ;;  %s1726_s23 = smov 112   ;;  %vm617_vm4 = vcmask 130112  }
   0x2   :  { %v50_v2 = vsel %vm49_vm0, %v1807_v0, 0.0  ;;  %v53_v3 = vsel %vm49_vm0, %v1812_v1, 0.0  ;;  %v1656_v15 = vld [vmem:[%s2074_s3 + $0x8] sm:$0xff]   ;;  %1520 = vmatprep.subr.bf16.mxu1 %v1718_v14  ;;  %1522 = vmatprep.mubr.msk.bf16.mxu1 %vm1719_vm1, %v1718_v14  ;;  %v1657_v16 = vld [vmem:[%s2074_s3] sm:$0xff]   ;;  %s1727_s24 = smov 48   ;;  %s1728_s25 = smov 72  }
   0x3   :  { %51 = vadd.xlane.f32.xlu0 %v50_v2  ;;  %1501 = vmatpush3.bf16.msra.mxu0 %v1656_v15  ;;  %v1407_v25 = vld [vmem:[%s2075_s1] ss:$0 sm:$0xff]  ;;  %s1720_s1 = smov 96   ;;  %s1729_s26 = smov 104   ;;  %vm850_vm5 = vcmask 195712   ;;  %vm1083_vm6 = vcmask 261312  }
   0x4   :  { %1502 = vmatprep.subr.bf16.mxu0 %v1718_v14  ;;  %v1408_v29 = vld [vmem:[%s2076_s2] ss:$0 sm:$0xff]  ;;  %s1721_s2 = smov 64   ;;  %s1730_s27 = smov 40  }
   0x5   :  { %v1409_v34 = vld [vmem:[%s2077_s4] ss:$0 sm:$0xff]  ;;  %s1722_s4 = smov 88   ;;  %s1731_s28 = smov 8  }
   0x6   :  { %s1732_s0 = smov 16   ;;  %s1733_s16 = smov 24  }
   0x7   :  { %54 = vadd.xlane.f32.xlu0 %v53_v3  ;;  %1503 = vmatpush3.bf16.msra.mxu0 %v1657_v16 }
   0x8   :  { %1508 = vmatprep.subr.bf16.mxu0 %v1718_v14 }
  0x8c   :  { %v52_v4 = vpop.xlane.xlu0 %51 }
  0x8d   :  { %v57_v5 = vmul.f32 0.03125, %v52_v4 }
  0x8f   :  { %v59_v6 = vsub.f32 %v1807_v0, %v57_v5 }
  0x90   :  { %v55_v7 = vpop.xlane.xlu0 %54 }
  0x91   :  { %v58_v8 = vmul.f32 0.03125, %v55_v7  ;;  %v61_v9 = vmul.f32 %v59_v6, %v59_v6 }
  0x93   :  { %v60_v10 = vsub.f32 %v1812_v1, %v58_v8  ;;  %v63_v11 = vsel %vm49_vm0, %v61_v9, 0.0 }
  0x94   :  { %64 = vadd.xlane.f32.xlu1 %v63_v11 }
  0x95   :  { %v62_v12 = vmul.f32 %v60_v10, %v60_v10 }
  0x97   :  { %v66_v13 = vsel %vm49_vm0, %v62_v12, 0.0 }
  0x98   :  { %67 = vadd.xlane.f32.xlu1 %v66_v13 }
 0x11d   :  { %v65_v17 = vpop.xlane.xlu1 %64 }
 0x11e   :  { %v69_v18 = vmul.f32 0.03125, %v65_v17 }
 0x120   :  { %v71_v19 = vadd.f32 1e-05, %v69_v18 }
 0x121   :  { %v68_v20 = vpop.xlane.xlu1 %67 }
 0x122   :  { %1670 = vrsqrt.f32 %v71_v19  ;;  %v70_v21 = vmul.f32 0.03125, %v68_v20 }
 0x124   :  { %v72_v22 = vadd.f32 1e-05, %v70_v21 }
 0x126   :  { %1672 = vrsqrt.f32 %v72_v22 }
 0x12f   :  { %v1671_v23 = vpop.eup %1670 }
 0x130   :  { %v75_v24 = vmul.f32 %v1671_v23, %v59_v6 }
 0x132   :  { %v83_v28 = vmul.f32 %v1407_v25, %v75_v24 }
 0x133   :  { %v1673_v26 = vpop.eup %1672 }
 0x134   :  { %v76_v27 = vmul.f32 %v1673_v26, %v60_v10  ;;  %v91_v31 = vadd.f32 %v1408_v29, %v83_v28 }
 0x136   :  { %v84_v30 = vmul.f32 %v1407_v25, %v76_v27 }
 0x138   :  { %v92_v32 = vadd.f32 %v1408_v29, %v84_v30 }
 0x13a   :  { %v93_v33 = vpack.c.bf16 %v92_v32, %v91_v31 }
 0x13c   :  { %1505 = vmatmul.mubr.msk.bf16.vlgmr.msra.gmra.mxu0 %vm49_vm0, %v93_v33 }
 0x13d   :  { %1510 = vmatprep.mubr.msk.bf16.mxu0 %vm1719_vm1, %v1718_v14 }
 0x1fc   :  { %v154_v35 = vpop.f32.mrf.mxu0 }
 0x1fd   :  { %v155_v36 = vadd.f32 %v1409_v34, %v154_v35 }
 0x1fe   :  { %v1506_v37 = vpop.f32.mrf.mxu0 }
 0x1ff   :  { %v1848_v38 = vpack.c.bf16 %v155_v36, %v155_v36 }
 0x200   :  { %v157_v39 = vpop.f32.mrf.mxu0 }
 0x201   :  { %v158_v40 = vadd.f32 %v1409_v34, %v157_v39  ;;  %164 = vrot.lane.b32.xlu0 %v1848_v38, %s1720_s1 }
 0x202   :  { %v1507_v41 = vpop.f32.mrf.mxu0 }
 0x203   :  { %v1851_v42 = vpack.c.bf16 %v158_v40, %v158_v40 }
 0x205   :  { %214 = vrot.lane.b32.xlu1 %v1851_v42, %s1720_s1 }
 0x273   :  { %v165_v43 = vpop.permute.xlu0 %164 }
 0x274   :  { %v171_v44 = vsel %vm166_vm2, %v165_v43, 0 }
 0x275   :  { %1509 = vmatpush3.bf16.xpose.msra.mxu0 %v171_v44 }
 0x276   :  { %1514 = vmatprep.subr.bf16.mxu0 %v1718_v14 }
 0x277   :  { %v215_v45 = vpop.permute.xlu1 %214 }
 0x278   :  { %v220_v46 = vsel %vm166_vm2, %v215_v45, 0 }
 0x27c   :  { %1511 = vmatmul.mubr.msk.bf16.vlgmr.msra.gmra.mxu0 %vm166_vm2, %v1848_v38 }
 0x27d   :  { %1515 = vmatpush3.bf16.xpose.msra.mxu0 %v220_v46  ;;  %1516 = vmatprep.mubr.msk.bf16.mxu0 %vm1719_vm1, %v1718_v14 }
 0x27e   :  { %1526 = vmatprep.subr.bf16.mxu0 %v1718_v14 }
 0x284   :  { %1517 = vmatmul.mubr.msk.bf16.vlgmr.msra.gmra.mxu0 %vm166_vm2, %v1851_v42 }
 0x285   :  { %1528 = vmatprep.mubr.msk.bf16.mxu0 %vm1719_vm1, %v1718_v14 }
 0x33c   :  { %v207_v47 = vpop.f32.mrf.mxu0 }
 0x33d   :  { %v262_v48 = vmul.f32 0.35355338, %v207_v47 }
 0x33e   :  { %v1512_v49 = vpop.f32.mrf.mxu0 }
 0x33f   :  { %v264_v50 = vsel %vm166_vm2, %v262_v48, -inf }
 0x340   :  { %265 = vmax.xlane.f32.xlu1 %v264_v50  ;;  %v210_v51 = vpop.f32.mrf.mxu0 }
 0x342   :  { %v1513_v52 = vpop.f32.mrf.mxu0 }
 0x344   :  { %v256_v53 = vpop.f32.mrf.mxu0 }
 0x345   :  { %v263_v54 = vmul.f32 0.35355338, %v256_v53 }
 0x346   :  { %v1518_v55 = vpop.f32.mrf.mxu0 }
 0x347   :  { %v267_v56 = vsel %vm166_vm2, %v263_v54, -inf }
 0x348   :  { %268 = vmax.xlane.f32.xlu0 %v267_v56  ;;  %v259_v57 = vpop.f32.mrf.mxu0 }
 0x34a   :  { %v1519_v58 = vpop.f32.mrf.mxu0 }
 0x351   :  { %337 = vrot.lane.b32.xlu1 %v1851_v42, %s1721_s2 }
 0x355   :  { %389 = vrot.lane.b32.xlu1 %v1848_v38, %s1722_s4 }
 0x3c9   :  { %v266_v59 = vpop.xlane.xlu1 %265 }
 0x3ca   :  { %v270_v60 = vsub.f32 %v262_v48, %v266_v59 }
 0x3cc   :  { %v272_v61 = vmul.f32 1.442695, %v270_v60 }
 0x3cd   :  { %v338_v62 = vpop.permute.xlu1 %337 }
 0x3ce   :  { %1674 = vpow2.f32 %v272_v61  ;;  %v343_v63 = vsel %vm293_vm3, %v338_v62, 0 }
 0x3cf   :  { %1527 = vmatpush3.bf16.msra.mxu0 %v343_v63 }
 0x3d0   :  { %1538 = vmatprep.subr.bf16.mxu0 %v1718_v14 }
 0x3d1   :  { %v269_v2 = vpop.xlane.xlu0 %268  ;;  %v390_v10 = vpop.permute.xlu1 %389 }
 0x3d2   :  { %v271_v3 = vsub.f32 %v263_v54, %v269_v2  ;;  %v395_v18 = vsel %vm166_vm2, %v390_v10, 0 }
 0x3d4   :  { %v274_v4 = vmul.f32 1.442695, %v271_v3 }
 0x3d6   :  { %1676 = vpow2.f32 %v274_v4 }
 0x3db   :  { %v1675_v5 = vpop.eup %1674 }
 0x3dc   :  { %v276_v6 = vsel %vm166_vm2, %v1675_v5, 0.0 }
 0x3dd   :  { %277 = vadd.xlane.f32.xlu0 %v276_v6 }
 0x3e3   :  { %v1677_v7 = vpop.eup %1676 }
 0x3e4   :  { %v279_v8 = vsel %vm166_vm2, %v1677_v7, 0.0 }
 0x3e5   :  { %280 = vadd.xlane.f32.xlu1 %v279_v8 }
 0x3f3   :  { %288 = vrot.lane.b32.xlu0 %v1848_v38, %s1721_s2 }
 0x3f6   :  { %439 = vrot.lane.b32.xlu1 %v1851_v42, %s1722_s4 }
 0x3f7   :  { %387 = vrot.lane.b32.xlu0 %v1848_v38, %s1723_s20 }
 0x3fa   :  { %437 = vrot.lane.b32.xlu1 %v1851_v42, %s1723_s20 }
 0x466   :  { %v278_v9 = vpop.xlane.xlu0 %277 }
 0x467   :  { %1678 = vrcp.f32 %v278_v9 }
 0x46a   :  { %v289_v11 = vpop.permute.xlu0 %288 }
 0x46b   :  { %v295_v12 = vsel %vm293_vm3, %v289_v11, 0 }
 0x46c   :  { %1521 = vmatpush3.bf16.msra.mxu1 %v295_v12 }
 0x46d   :  { %1532 = vmatprep.subr.bf16.mxu1 %v1718_v14 }
 0x46e   :  { %v281_v13 = vpop.xlane.xlu1 %280  ;;  %v388_v23 = vpop.permute.xlu0 %387 }
 0x46f   :  { %1680 = vrcp.f32 %v281_v13 }
 0x472   :  { %v440_v21 = vpop.permute.xlu1 %439 }
 0x473   :  { %v445_v24 = vsel %vm166_vm2, %v440_v21, 0 }
 0x474   :  { %v1679_v15 = vpop.eup %1678 }
 0x475   :  { %v284_v16 = vmul.f32 %v1679_v15, %v1675_v5 }
 0x476   :  { %v438_v25 = vpop.permute.xlu1 %437 }
 0x477   :  { %v286_v17 = vpack.c.bf16 %v284_v16, %v284_v16 }
 0x479   :  { %1523 = vmatmul.mubr.msk.bf16.vlgmr.msra.gmra.mxu1 %vm166_vm2, %v286_v17 }
 0x47a   :  { %1533 = vmatpush3.bf16.xpose.msra.mxu1 %v395_v18  ;;  %1534 = vmatprep.mubr.msk.bf16.mxu1 %vm1719_vm1, %v1718_v14 }
 0x47b   :  { %1544 = vmatprep.subr.bf16.mxu1 %v1718_v14 }
 0x47c   :  { %v1681_v19 = vpop.eup %1680 }
 0x47d   :  { %v285_v20 = vmul.f32 %v1681_v19, %v1677_v7 }
 0x47f   :  { %v287_v22 = vpack.c.bf16 %v285_v20, %v285_v20 }
 0x481   :  { %1529 = vmatmul.mubr.msk.bf16.vlgmr.msra.gmra.mxu0 %vm166_vm2, %v287_v22  ;;  %1535 = vmatmul.mubr.msk.bf16.vlgmr.msra.gmra.mxu1 %vm166_vm2, %v388_v23 }
 0x482   :  { %1539 = vmatpush3.bf16.xpose.msra.mxu0 %v445_v24  ;;  %1540 = vmatprep.mubr.msk.bf16.mxu0 %vm1719_vm1, %v1718_v14 }
 0x483   :  { %1550 = vmatprep.subr.bf16.mxu0 %v1718_v14  ;;  %1546 = vmatprep.mubr.msk.bf16.mxu1 %vm1719_vm1, %v1718_v14 }
 0x489   :  { %1541 = vmatmul.mubr.msk.bf16.vlgmr.msra.gmra.mxu0 %vm166_vm2, %v438_v25 }
 0x48a   :  { %1552 = vmatprep.mubr.msk.bf16.mxu0 %vm1719_vm1, %v1718_v14 }
 0x539   :  { %v331_v26 = vpop.f32.mrf.mxu1 }
 0x53a   :  { %385 = vst.msk [vmem:[#allocation2] sm:$0xff] %vm166_vm2, %v331_v26 }
 0x53b   :  { %v1524_v27 = vpop.f32.mrf.mxu1 }
 0x53d   :  { %v334_v28 = vpop.f32.mrf.mxu1 }
 0x53f   :  { %v1525_v29 = vpop.f32.mrf.mxu1 }
 0x541   :  { %v379_v30 = vpop.f32.mrf.mxu0  ;;  %v431_v31 = vpop.f32.mrf.mxu1 }
 0x542   :  { %386 = vst.msk [vmem:[#allocation2 + $0x8] sm:$0xff] %vm166_vm2, %v379_v30  ;;  %v487_v32 = vmul.f32 0.35355338, %v431_v31 }
 0x543   :  { %v1530_v33 = vpop.f32.mrf.mxu0  ;;  %v1536_v34 = vpop.f32.mrf.mxu1 }
 0x544   :  { %v489_v35 = vsel %vm166_vm2, %v487_v32, -inf }
 0x545   :  { %490 = vmax.xlane.f32.xlu0 %v489_v35  ;;  %v382_v36 = vpop.f32.mrf.mxu0  ;;  %v434_v37 = vpop.f32.mrf.mxu1 }
 0x547   :  { %v1531_v39 = vpop.f32.mrf.mxu0  ;;  %v1537_v40 = vpop.f32.mrf.mxu1 }
 0x549   :  { %v481_v41 = vpop.f32.mrf.mxu0 }
 0x54a   :  { %v488_v43 = vmul.f32 0.35355338, %v481_v41 }
 0x54b   :  { %v1542_v44 = vpop.f32.mrf.mxu0 }
 0x54c   :  { %v492_v45 = vsel %vm166_vm2, %v488_v43, -inf }
 0x54d   :  { %493 = vmax.xlane.f32.xlu1 %v492_v45  ;;  %v484_v46 = vpop.f32.mrf.mxu0 }
 0x54f   :  { %v1543_v47 = vpop.f32.mrf.mxu0 }
 0x55e   :  { %561 = vrot.lane.b32.xlu1 %v1851_v42, %s1724_s21 }
 0x562   :  { %622 = vrot.lane.b32.xlu1 %v1848_v38, %s1725_s22 }
 0x566   :  { %672 = vrot.lane.b32.xlu1 %v1851_v42, %s1725_s22 }
 0x56a   :  { %670 = vrot.lane.b32.xlu1 %v1851_v42, %s1726_s23 }
 0x5ce   :  { %v491_v48 = vpop.xlane.xlu0 %490 }
 0x5cf   :  { %v495_v49 = vsub.f32 %v487_v32, %v491_v48 }
 0x5d1   :  { %v497_v50 = vmul.f32 1.442695, %v495_v49 }
 0x5d3   :  { %1682 = vpow2.f32 %v497_v50 }
 0x5d6   :  { %v494_v51 = vpop.xlane.xlu1 %493 }
 0x5d7   :  { %v496_v52 = vsub.f32 %v488_v43, %v494_v51 }
 0x5d9   :  { %v499_v53 = vmul.f32 1.442695, %v496_v52 }
 0x5da   :  { %v562_v54 = vpop.permute.xlu1 %561 }
 0x5db   :  { %1684 = vpow2.f32 %v499_v53  ;;  %v567_v55 = vsel %vm293_vm3, %v562_v54, 0 }
 0x5dc   :  { %1551 = vmatpush3.bf16.msra.mxu0 %v567_v55 }
 0x5dd   :  { %1562 = vmatprep.subr.bf16.mxu0 %v1718_v14 }
 0x5de   :  { %v623_v4 = vpop.permute.xlu1 %622 }
 0x5df   :  { %v628_v6 = vsel %vm166_vm2, %v623_v4, 0 }
 0x5e0   :  { %v1683_v56 = vpop.eup %1682 }
 0x5e1   :  { %v501_v57 = vsel %vm166_vm2, %v1683_v56, 0.0 }
 0x5e2   :  { %502 = vadd.xlane.f32.xlu0 %v501_v57  ;;  %v673_v9 = vpop.permute.xlu1 %672 }
 0x5e3   :  { %v678_v12 = vsel %vm166_vm2, %v673_v9, 0 }
 0x5e6   :  { %v671_v13 = vpop.permute.xlu1 %670 }
 0x5e8   :  { %v1685_v58 = vpop.eup %1684 }
 0x5e9   :  { %v504_v59 = vsel %vm166_vm2, %v1685_v58, 0.0 }
 0x5ea   :  { %505 = vadd.xlane.f32.xlu0 %v504_v59 }
 0x600   :  { %513 = vrot.lane.b32.xlu0 %v1848_v38, %s1724_s21 }
 0x604   :  { %620 = vrot.lane.b32.xlu0 %v1848_v38, %s1726_s23 }
 0x66b   :  { %v503_v60 = vpop.xlane.xlu0 %502 }
 0x66c   :  { %1686 = vrcp.f32 %v503_v60 }
 0x673   :  { %v506_v61 = vpop.xlane.xlu0 %505 }
 0x674   :  { %1688 = vrcp.f32 %v506_v61 }
 0x677   :  { %v514_v62 = vpop.permute.xlu0 %513 }
 0x678   :  { %v519_v63 = vsel %vm293_vm3, %v514_v62, 0 }
 0x679   :  { %v1687_v2 = vpop.eup %1686  ;;  %1545 = vmatpush3.bf16.msra.mxu1 %v519_v63 }
 0x67a   :  { %1556 = vmatprep.subr.bf16.mxu1 %v1718_v14  ;;  %v509_v3 = vmul.f32 %v1687_v2, %v1683_v56 }
 0x67b   :  { %v621_v11 = vpop.permute.xlu0 %620 }
 0x67c   :  { %v511_v5 = vpack.c.bf16 %v509_v3, %v509_v3 }
 0x67e   :  { %1547 = vmatmul.mubr.msk.bf16.vlgmr.msra.gmra.mxu1 %vm166_vm2, %v511_v5 }
 0x67f   :  { %1557 = vmatpush3.bf16.xpose.msra.mxu1 %v628_v6  ;;  %1558 = vmatprep.mubr.msk.bf16.mxu1 %vm1719_vm1, %v1718_v14 }
 0x680   :  { %1568 = vmatprep.subr.bf16.mxu1 %v1718_v14 }
 0x681   :  { %v1689_v7 = vpop.eup %1688 }
 0x682   :  { %v510_v8 = vmul.f32 %v1689_v7, %v1685_v58 }
 0x684   :  { %v512_v10 = vpack.c.bf16 %v510_v8, %v510_v8 }
 0x686   :  { %1553 = vmatmul.mubr.msk.bf16.vlgmr.msra.gmra.mxu0 %vm166_vm2, %v512_v10  ;;  %1559 = vmatmul.mubr.msk.bf16.vlgmr.msra.gmra.mxu1 %vm166_vm2, %v621_v11 }
 0x687   :  { %1563 = vmatpush3.bf16.xpose.msra.mxu0 %v678_v12  ;;  %1564 = vmatprep.mubr.msk.bf16.mxu0 %vm1719_vm1, %v1718_v14 }
 0x688   :  { %1574 = vmatprep.subr.bf16.mxu0 %v1718_v14  ;;  %1570 = vmatprep.mubr.msk.bf16.mxu1 %vm1719_vm1, %v1718_v14 }
 0x68e   :  { %1565 = vmatmul.mubr.msk.bf16.vlgmr.msra.gmra.mxu0 %vm166_vm2, %v671_v13 }
 0x68f   :  { %1576 = vmatprep.mubr.msk.bf16.mxu0 %vm1719_vm1, %v1718_v14 }
 0x73e   :  { %v1928_v15 = vpop.f32.mrf.mxu1 }
 0x740   :  { %v1548_v16 = vpop.f32.mrf.mxu1 }
 0x742   :  { %v558_v17 = vpop.f32.mrf.mxu1 }
 0x744   :  { %v1549_v18 = vpop.f32.mrf.mxu1 }
 0x746   :  { %v1930_v19 = vpop.f32.mrf.mxu0  ;;  %v664_v20 = vpop.f32.mrf.mxu1 }
 0x747   :  { %v720_v21 = vmul.f32 0.35355338, %v664_v20 }
 0x748   :  { %v1554_v22 = vpop.f32.mrf.mxu0  ;;  %v1560_v23 = vpop.f32.mrf.mxu1 }
 0x749   :  { %v722_v24 = vsel %vm166_vm2, %v720_v21, -inf }
 0x74a   :  { %723 = vmax.xlane.f32.xlu0 %v722_v24  ;;  %v606_v25 = vpop.f32.mrf.mxu0  ;;  %v667_v26 = vpop.f32.mrf.mxu1 }
 0x74c   :  { %v1555_v27 = vpop.f32.mrf.mxu0  ;;  %v1561_v28 = vpop.f32.mrf.mxu1 }
 0x74e   :  { %v714_v29 = vpop.f32.mrf.mxu0 }
 0x74f   :  { %v721_v30 = vmul.f32 0.35355338, %v714_v29 }
 0x750   :  { %v1566_v31 = vpop.f32.mrf.mxu0 }
 0x751   :  { %v725_v32 = vsel %vm166_vm2, %v721_v30, -inf }
 0x752   :  { %726 = vmax.xlane.f32.xlu1 %v725_v32  ;;  %v717_v33 = vpop.f32.mrf.mxu0 }
 0x754   :  { %v1567_v34 = vpop.f32.mrf.mxu0 }
 0x763   :  { %794 = vrot.lane.b32.xlu1 %v1851_v42, %s1727_s24 }
 0x767   :  { %855 = vrot.lane.b32.xlu1 %v1848_v38, %s1728_s25 }
 0x76b   :  { %905 = vrot.lane.b32.xlu1 %v1851_v42, %s1728_s25 }
 0x76f   :  { %903 = vrot.lane.b32.xlu1 %v1851_v42, %s1729_s26 }
 0x7d3   :  { %v724_v35 = vpop.xlane.xlu0 %723 }
 0x7d4   :  { %v728_v36 = vsub.f32 %v720_v21, %v724_v35 }
 0x7d6   :  { %v730_v37 = vmul.f32 1.442695, %v728_v36 }
 0x7d8   :  { %1690 = vpow2.f32 %v730_v37 }
 0x7db   :  { %v727_v39 = vpop.xlane.xlu1 %726 }
 0x7dc   :  { %v729_v40 = vsub.f32 %v721_v30, %v727_v39 }
 0x7de   :  { %v732_v41 = vmul.f32 1.442695, %v729_v40 }
 0x7df   :  { %v795_v43 = vpop.permute.xlu1 %794 }
 0x7e0   :  { %1692 = vpow2.f32 %v732_v41  ;;  %v800_v44 = vsel %vm293_vm3, %v795_v43, 0 }
 0x7e1   :  { %1575 = vmatpush3.bf16.msra.mxu0 %v800_v44 }
 0x7e2   :  { %1586 = vmatprep.subr.bf16.mxu0 %v1718_v14 }
 0x7e3   :  { %v856_v55 = vpop.permute.xlu1 %855 }
 0x7e4   :  { %v861_v57 = vsel %vm166_vm2, %v856_v55, 0 }
 0x7e5   :  { %v1691_v45 = vpop.eup %1690 }
 0x7e6   :  { %v734_v46 = vsel %vm166_vm2, %v1691_v45, 0.0 }
 0x7e7   :  { %735 = vadd.xlane.f32.xlu0 %v734_v46  ;;  %v906_v60 = vpop.permute.xlu1 %905 }
 0x7e8   :  { %v911_v63 = vsel %vm166_vm2, %v906_v60, 0 }
 0x7eb   :  { %v904_v2 = vpop.permute.xlu1 %903 }
 0x7ed   :  { %v1693_v47 = vpop.eup %1692 }
 0x7ee   :  { %v737_v48 = vsel %vm166_vm2, %v1693_v47, 0.0 }
 0x7ef   :  { %738 = vadd.xlane.f32.xlu0 %v737_v48 }
 0x805   :  { %746 = vrot.lane.b32.xlu0 %v1848_v38, %s1727_s24 }
 0x809   :  { %853 = vrot.lane.b32.xlu0 %v1848_v38, %s1729_s26 }
 0x870   :  { %v736_v49 = vpop.xlane.xlu0 %735 }
 0x871   :  { %1694 = vrcp.f32 %v736_v49 }
 0x878   :  { %v739_v50 = vpop.xlane.xlu0 %738 }
 0x879   :  { %1696 = vrcp.f32 %v739_v50  ;;  %v1658_v50 = vld [vmem:[%s2078_s5 + $0x8] sm:$0xff]  }
 0x87c   :  { %v747_v51 = vpop.permute.xlu0 %746 }
 0x87d   :  { %v752_v52 = vsel %vm293_vm3, %v747_v51, 0  ;;  %v1659_v51 = vld [vmem:[%s2078_s5] sm:$0xff]  }
 0x87e   :  { %v1695_v53 = vpop.eup %1694  ;;  %1569 = vmatpush3.bf16.msra.mxu1 %v752_v52 }
 0x87f   :  { %1580 = vmatprep.subr.bf16.mxu1 %v1718_v14  ;;  %v742_v54 = vmul.f32 %v1695_v53, %v1691_v45 }
 0x880   :  { %v854_v62 = vpop.permute.xlu0 %853 }
 0x881   :  { %v744_v56 = vpack.c.bf16 %v742_v54, %v742_v54 }
 0x883   :  { %1571 = vmatmul.mubr.msk.bf16.vlgmr.msra.gmra.mxu1 %vm166_vm2, %v744_v56 }
 0x884   :  { %1581 = vmatpush3.bf16.xpose.msra.mxu1 %v861_v57  ;;  %1582 = vmatprep.mubr.msk.bf16.mxu1 %vm1719_vm1, %v1718_v14 }
 0x885   :  { %1592 = vmatprep.subr.bf16.mxu1 %v1718_v14 }
 0x886   :  { %v1697_v58 = vpop.eup %1696 }
 0x887   :  { %v743_v59 = vmul.f32 %v1697_v58, %v1693_v47 }
 0x889   :  { %v745_v61 = vpack.c.bf16 %v743_v59, %v743_v59 }
 0x88b   :  { %1577 = vmatmul.mubr.msk.bf16.vlgmr.msra.gmra.mxu0 %vm166_vm2, %v745_v61  ;;  %1583 = vmatmul.mubr.msk.bf16.vlgmr.msra.gmra.mxu1 %vm166_vm2, %v854_v62 }
 0x88c   :  { %1587 = vmatpush3.bf16.xpose.msra.mxu0 %v911_v63  ;;  %1588 = vmatprep.mubr.msk.bf16.mxu0 %vm1719_vm1, %v1718_v14 }
 0x88d   :  { %1598 = vmatprep.subr.bf16.mxu0 %v1718_v14  ;;  %1594 = vmatprep.mubr.msk.bf16.mxu1 %vm1719_vm1, %v1718_v14 }
 0x893   :  { %1589 = vmatmul.mubr.msk.bf16.vlgmr.msra.gmra.mxu0 %vm166_vm2, %v904_v2 }
 0x894   :  { %1600 = vmatprep.mubr.msk.bf16.mxu0 %vm1719_vm1, %v1718_v14 }
 0x943   :  { %v788_v3 = vpop.f32.mrf.mxu1 }
 0x945   :  { %v1572_v4 = vpop.f32.mrf.mxu1 }
 0x947   :  { %v791_v5 = vpop.f32.mrf.mxu1 }
 0x949   :  { %v1573_v6 = vpop.f32.mrf.mxu1 }
 0x94b   :  { %v836_v7 = vpop.f32.mrf.mxu0  ;;  %v897_v8 = vpop.f32.mrf.mxu1 }
 0x94c   :  { %v953_v9 = vmul.f32 0.35355338, %v897_v8 }
 0x94d   :  { %v1578_v10 = vpop.f32.mrf.mxu0  ;;  %v1584_v11 = vpop.f32.mrf.mxu1 }
 0x94e   :  { %v955_v12 = vsel %vm166_vm2, %v953_v9, -inf }
 0x94f   :  { %956 = vmax.xlane.f32.xlu0 %v955_v12  ;;  %v839_v13 = vpop.f32.mrf.mxu0  ;;  %v900_v16 = vpop.f32.mrf.mxu1 }
 0x951   :  { %v1579_v17 = vpop.f32.mrf.mxu0  ;;  %v1585_v18 = vpop.f32.mrf.mxu1 }
 0x953   :  { %v947_v20 = vpop.f32.mrf.mxu0 }
 0x954   :  { %v954_v21 = vmul.f32 0.35355338, %v947_v20 }
 0x955   :  { %v1590_v22 = vpop.f32.mrf.mxu0 }
 0x956   :  { %v958_v23 = vsel %vm166_vm2, %v954_v21, -inf }
 0x957   :  { %959 = vmax.xlane.f32.xlu1 %v958_v23  ;;  %v950_v24 = vpop.f32.mrf.mxu0 }
 0x959   :  { %v1591_v25 = vpop.f32.mrf.mxu0 }
 0x95a   :  { %v1660_v25 = vld [vmem:[%s2080_s9 + $0x8] sm:$0xff]  }
 0x968   :  { %1027 = vrot.lane.b32.xlu1 %v1851_v42, %s1730_s27 }
 0x96c   :  { %611 = vrot.lane.b32.xlu1 %v1928_v15, %s1731_s28 }
 0x970   :  { %613 = vrot.lane.b32.xlu1 %v1930_v19, %s1731_s28 }
 0x974   :  { %846 = vrot.lane.b32.xlu1 %v836_v7, %s1732_s0 }
 0x9d8   :  { %v957_v26 = vpop.xlane.xlu0 %956 }
 0x9d9   :  { %v961_v27 = vsub.f32 %v953_v9, %v957_v26  ;;  %v1661_v26 = vld [vmem:[%s2080_s9] sm:$0xff]  }
 0x9db   :  { %v963_v28 = vmul.f32 1.442695, %v961_v27 }
 0x9dd   :  { %1698 = vpow2.f32 %v963_v28 }
 0x9e0   :  { %v960_v29 = vpop.xlane.xlu1 %959 }
 0x9e1   :  { %v962_v30 = vsub.f32 %v954_v21, %v960_v29 }
 0x9e3   :  { %v965_v31 = vmul.f32 1.442695, %v962_v30 }
 0x9e4   :  { %v1028_v32 = vpop.permute.xlu1 %1027 }
 0x9e5   :  { %1700 = vpow2.f32 %v965_v31  ;;  %v1033_v33 = vsel %vm293_vm3, %v1028_v32, 0 }
 0x9e6   :  { %1599 = vmatpush3.bf16.msra.mxu0 %v1033_v33 }
 0x9e7   :  { %1612 = vmatprep.subr.bf16.mxu0 %v1718_v14 }
 0x9e8   :  { %v612_v42 = vpop.permute.xlu1 %611 }
 0x9e9   :  { %618 = vst.msk [vmem:[#allocation2] sm:$0xff] %vm617_vm4, %v612_v42 }
 0x9ea   :  { %v1699_v15 = vpop.eup %1698 }
 0x9eb   :  { %v967_v19 = vsel %vm166_vm2, %v1699_v15, 0.0 }
 0x9ec   :  { %968 = vadd.xlane.f32.xlu0 %v967_v19  ;;  %v614_v34 = vpop.permute.xlu1 %613 }
 0x9ed   :  { %619 = vst.msk [vmem:[#allocation2 + $0x8] sm:$0xff] %vm617_vm4, %v614_v34 }
 0x9f0   :  { %v847_v35 = vpop.permute.xlu1 %846 }
 0x9f1   :  { %852 = vst.msk [vmem:[#allocation2 + $0x8] sm:$0xff] %vm850_vm5, %v847_v35 }
 0x9f2   :  { %v1701_v36 = vpop.eup %1700 }
 0x9f3   :  { %v970_v37 = vsel %vm166_vm2, %v1701_v36, 0.0 }
 0x9f4   :  { %971 = vadd.xlane.f32.xlu0 %v970_v37 }
 0xa0a   :  { %979 = vrot.lane.b32.xlu0 %v1848_v38, %s1730_s27 }
 0xa0e   :  { %844 = vrot.lane.b32.xlu0 %v788_v3, %s1732_s0  ;;  %v1429_v3 = vld [vmem:[%s2079_s6] ss:$0 sm:$0xff] }
 0xa75   :  { %v969_v39 = vpop.xlane.xlu0 %968 }
 0xa76   :  { %1702 = vrcp.f32 %v969_v39 }
 0xa7d   :  { %v972_v40 = vpop.xlane.xlu0 %971 }
 0xa7e   :  { %1704 = vrcp.f32 %v972_v40 }
 0xa81   :  { %v980_v41 = vpop.permute.xlu0 %979 }
 0xa82   :  { %v985_v43 = vsel %vm293_vm3, %v980_v41, 0 }
 0xa83   :  { %v1703_v44 = vpop.eup %1702  ;;  %1593 = vmatpush3.bf16.msra.mxu1 %v985_v43  ;;  %v1662_v43 = vld [vmem:[%s2083_s11 + $0x38] sm:$0xff]  }
 0xa84   :  { %v975_v45 = vmul.f32 %v1703_v44, %v1699_v15  ;;  %1604 = vmatprep.subr.bf16.mxu1 %v1718_v14  ;;  %v1433_v15 = vld [vmem:[%s2081_s7] ss:$0 sm:$0xff]  ;;  %v1663_v44 = vld [vmem:[%s2083_s11 + $0x30] sm:$0xff]  }
 0xa85   :  { %v845_v46 = vpop.permute.xlu0 %844 }
 0xa86   :  { %851 = vst.msk [vmem:[#allocation2] sm:$0xff] %vm850_vm5, %v845_v46  ;;  %v977_v47 = vpack.c.bf16 %v975_v45, %v975_v45  ;;  %v1664_v45 = vld [vmem:[%s2083_s11 + $0x28] sm:$0xff]   ;;  %v1665_v46 = vld [vmem:[%s2083_s11 + $0x20] sm:$0xff]  }
 0xa88   :  { %1595 = vmatmul.mubr.msk.bf16.vlgmr.msra.gmra.mxu1 %vm166_vm2, %v977_v47  ;;  %v1666_v47 = vld [vmem:[%s2083_s11 + $0x18] sm:$0xff]  }
 0xa89   :  { %1608 = vmatprep.mubr.msk.bf16.mxu1 %vm1719_vm1, %v1718_v14  ;;  %1605 = vmatpush3.bf16.msra.mxu1 %v1658_v50  ;;  %v1435_v50 = vld [vmem:[%s2084_s10] ss:$0 sm:$0xff] }
 0xa8a   :  { %1606 = vmatprep.subr.bf16.mxu1 %v1718_v14 }
 0xa8b   :  { %v1705_v38 = vpop.eup %1704 }
 0xa8c   :  { %v976_v48 = vmul.f32 %v1705_v38, %v1701_v36  ;;  %v1434_v36 = vld [vmem:[%s2082_s8] ss:$0 sm:$0xff]  ;;  %v1667_v38 = vld [vmem:[%s2083_s11 + $0x10] sm:$0xff]  }
 0xa8d   :  { %1607 = vmatpush3.bf16.msra.mxu1 %v1659_v51 }
 0xa8e   :  { %v978_v49 = vpack.c.bf16 %v976_v48, %v976_v48  ;;  %1620 = vmatprep.subr.bf16.mxu1 %v1718_v14  ;;  %v1668_v48 = vld [vmem:[%s2083_s11 + $0x8] sm:$0xff]  }
 0xa90   :  { %1601 = vmatmul.mubr.msk.bf16.vlgmr.msra.gmra.mxu0 %vm166_vm2, %v978_v49  ;;  %v1669_v49 = vld [vmem:[%s2083_s11] sm:$0xff]  }
 0xa91   :  { %1616 = vmatprep.mubr.msk.bf16.mxu0 %vm1719_vm1, %v1718_v14  ;;  %1613 = vmatpush3.bf16.msra.mxu0 %v1660_v25 }
 0xa92   :  { %1614 = vmatprep.subr.bf16.mxu0 %v1718_v14 }
 0xa95   :  { %1615 = vmatpush3.bf16.msra.mxu0 %v1661_v26 }
 0xb48   :  { %v1021_v52 = vpop.f32.mrf.mxu1 }
 0xb49   :  { %1077 = vrot.lane.b32.xlu0 %v1021_v52, %s1733_s16 }
 0xb4a   :  { %v1596_v53 = vpop.f32.mrf.mxu1 }
 0xb4c   :  { %v1024_v54 = vpop.f32.mrf.mxu1 }
 0xb4e   :  { %v1597_v55 = vpop.f32.mrf.mxu1 }
 0xb50   :  { %v1069_v56 = vpop.f32.mrf.mxu0 }
 0xb51   :  { %1079 = vrot.lane.b32.xlu1 %v1069_v56, %s1733_s16 }
 0xb52   :  { %v1602_v57 = vpop.f32.mrf.mxu0 }
 0xb54   :  { %v1072_v58 = vpop.f32.mrf.mxu0 }
 0xb56   :  { %v1603_v59 = vpop.f32.mrf.mxu0 }
 0xbbb   :  { %v1078_v60 = vpop.permute.xlu0 %1077 }
 0xbbc   :  { %1084 = vst.msk [vmem:[#allocation2] sm:$0xff] %vm1083_vm6, %v1078_v60 }
 0xbc3   :  { %v1080_v61 = vpop.permute.xlu1 %1079  ;;  %v1086_v62 = vld [vmem:[#allocation2] sm:$0xff] }
 0xbc4   :  { %1085 = vst.msk [vmem:[#allocation2 + $0x8] sm:$0xff] %vm1083_vm6, %v1080_v61 }
 0xbcb   :  { %v1087_v63 = vld [vmem:[#allocation2 + $0x8] sm:$0xff] }
 0xbcc   :  { %v1088_v2 = vpack.c.bf16 %v1087_v63, %v1086_v62 }
 0xbce   :  { %1609 = vmatmul.mubr.msk.bf16.vlgmr.msra.gmra.mxu1 %vm49_vm0, %v1088_v2 }
 0xbcf   :  { %1636 = vmatprep.mubr.msk.bf16.mxu1 %vm1719_vm1, %v1718_v14  ;;  %1621 = vmatpush3.bf16.msra.mxu1 %v1662_v43 }
 0xbd0   :  { %1622 = vmatprep.subr.bf16.mxu1 %v1718_v14 }
 0xbd3   :  { %1623 = vmatpush3.bf16.msra.mxu1 %v1663_v44 }
 0xbd4   :  { %1624 = vmatprep.subr.bf16.mxu1 %v1718_v14 }
 0xbd7   :  { %1625 = vmatpush3.bf16.msra.mxu1 %v1664_v45 }
 0xbd8   :  { %1626 = vmatprep.subr.bf16.mxu1 %v1718_v14 }
 0xbdb   :  { %1627 = vmatpush3.bf16.msra.mxu1 %v1665_v46 }
 0xbdc   :  { %1628 = vmatprep.subr.bf16.mxu1 %v1718_v14 }
 0xbdf   :  { %1629 = vmatpush3.bf16.msra.mxu1 %v1666_v47 }
 0xbe0   :  { %1630 = vmatprep.subr.bf16.mxu1 %v1718_v14 }
 0xbe3   :  { %1631 = vmatpush3.bf16.msra.mxu1 %v1667_v38 }
 0xbe4   :  { %1632 = vmatprep.subr.bf16.mxu1 %v1718_v14 }
 0xbe7   :  { %1633 = vmatpush3.bf16.msra.mxu1 %v1668_v48 }
 0xbe8   :  { %1634 = vmatprep.subr.bf16.mxu1 %v1718_v14 }
 0xbeb   :  { %1635 = vmatpush3.bf16.msra.mxu1 %v1669_v49 }
 0xc8e   :  { %v1149_v4 = vpop.f32.mrf.mxu1 }
 0xc8f   :  { %v1150_v5 = vadd.f32 %v1429_v3, %v1149_v4 }
 0xc90   :  { %v1610_v6 = vpop.f32.mrf.mxu1 }
 0xc91   :  { %v1999_v7 = vadd.f32 %v1150_v5, %v1807_v0 }
 0xc92   :  { %v1152_v8 = vpop.f32.mrf.mxu1 }
 0xc93   :  { %v1153_v9 = vadd.f32 %v1429_v3, %v1152_v8  ;;  %v1160_v10 = vsel %vm49_vm0, %v1999_v7, 0.0  ;;  %v1441_v8 = vld [vmem:[%s2085_s12] ss:$0 sm:$0xff] }
 0xc94   :  { %1161 = vadd.xlane.f32.xlu0 %v1160_v10  ;;  %v1611_v11 = vpop.f32.mrf.mxu1 }
 0xc95   :  { %v2004_v12 = vadd.f32 %v1153_v9, %v1812_v1 }
 0xc97   :  { %v1163_v13 = vsel %vm49_vm0, %v2004_v12, 0.0 }
 0xc98   :  { %1164 = vadd.xlane.f32.xlu1 %v1163_v13 }
 0xd1d   :  { %v1162_v16 = vpop.xlane.xlu0 %1161 }
 0xd1e   :  { %v1166_v17 = vmul.f32 0.03125, %v1162_v16 }
 0xd20   :  { %v1168_v18 = vsub.f32 %v1999_v7, %v1166_v17 }
 0xd21   :  { %v1165_v0 = vpop.xlane.xlu1 %1164 }
 0xd22   :  { %v1167_v20 = vmul.f32 0.03125, %v1165_v0  ;;  %v1170_v21 = vmul.f32 %v1168_v18, %v1168_v18 }
 0xd24   :  { %v1169_v22 = vsub.f32 %v2004_v12, %v1167_v20  ;;  %v1172_v23 = vsel %vm49_vm0, %v1170_v21, 0.0 }
 0xd25   :  { %1173 = vadd.xlane.f32.xlu0 %v1172_v23 }
 0xd26   :  { %v1171_v24 = vmul.f32 %v1169_v22, %v1169_v22 }
 0xd28   :  { %v1175_v1 = vsel %vm49_vm0, %v1171_v24, 0.0 }
 0xd29   :  { %1176 = vadd.xlane.f32.xlu0 %v1175_v1 }
 0xdae   :  { %v1174_v27 = vpop.xlane.xlu0 %1173 }
 0xdaf   :  { %v1178_v28 = vmul.f32 0.03125, %v1174_v27 }
 0xdb1   :  { %v1180_v29 = vadd.f32 1e-05, %v1178_v28 }
 0xdb2   :  { %v1177_v30 = vpop.xlane.xlu0 %1176 }
 0xdb3   :  { %1706 = vrsqrt.f32 %v1180_v29  ;;  %v1179_v31 = vmul.f32 0.03125, %v1177_v30 }
 0xdb5   :  { %v1181_v32 = vadd.f32 1e-05, %v1179_v31 }
 0xdb7   :  { %1708 = vrsqrt.f32 %v1181_v32 }
 0xdc0   :  { %v1707_v33 = vpop.eup %1706 }
 0xdc1   :  { %v1184_v42 = vmul.f32 %v1707_v33, %v1168_v18 }
 0xdc3   :  { %v1192_v35 = vmul.f32 %v1433_v15, %v1184_v42 }
 0xdc4   :  { %v1709_v19 = vpop.eup %1708 }
 0xdc5   :  { %v1185_v34 = vmul.f32 %v1709_v19, %v1169_v22  ;;  %v1200_v39 = vadd.f32 %v1434_v36, %v1192_v35 }
 0xdc7   :  { %v1193_v37 = vmul.f32 %v1433_v15, %v1185_v34 }
 0xdc9   :  { %v1201_v40 = vadd.f32 %v1434_v36, %v1193_v37 }
 0xdcb   :  { %v1202_v41 = vpack.c.bf16 %v1201_v40, %v1200_v39 }
 0xdcd   :  { %1617 = vmatmul.mubr.msk.bf16.vlgmr.msra.gmra.mxu0 %vm49_vm0, %v1202_v41 }
 0xe8d   :  { %v1263_v51 = vpop.f32.mrf.mxu0 }
 0xe8e   :  { %v1264_v52 = vadd.f32 %v1435_v50, %v1263_v51 }
 0xe8f   :  { %v1618_v53 = vpop.f32.mrf.mxu0 }
 0xe90   :  { %v1439_v54 = vmul.f32 -1.702, %v1264_v52 }
 0xe91   :  { %v1266_v55 = vpop.f32.mrf.mxu0 }
 0xe92   :  { %v1274_v56 = vmul.f32 1.442695, %v1439_v54  ;;  %v1267_v57 = vadd.f32 %v1435_v50, %v1266_v55 }
 0xe93   :  { %v1619_v58 = vpop.f32.mrf.mxu0 }
 0xe94   :  { %1710 = vpow2.f32 %v1274_v56  ;;  %v1440_v59 = vmul.f32 -1.702, %v1267_v57 }
 0xe96   :  { %v1276_v14 = vmul.f32 1.442695, %v1440_v59 }
 0xe98   :  { %1712 = vpow2.f32 %v1276_v14 }
 0xea1   :  { %v1711_v60 = vpop.eup %1710 }
 0xea2   :  { %v1278_v61 = vadd.f32 1.0, %v1711_v60 }
 0xea4   :  { %1714 = vrcp.f32 %v1278_v61 }
 0xea5   :  { %v1713_v62 = vpop.eup %1712 }
 0xea6   :  { %v1279_v63 = vadd.f32 1.0, %v1713_v62 }
 0xea8   :  { %1716 = vrcp.f32 %v1279_v63 }
 0xeb1   :  { %v1715_v2 = vpop.eup %1714 }
 0xeb2   :  { %v1284_v4 = vmul.f32 %v1715_v2, %v1264_v52 }
 0xeb5   :  { %v1717_v3 = vpop.eup %1716 }
 0xeb6   :  { %v1285_v5 = vmul.f32 %v1717_v3, %v1267_v57 }
 0xeb8   :  { %v1286_v6 = vpack.c.bf16 %v1285_v5, %v1284_v4 }
 0xeba   :  { %1637 = vmatmul.mubr.bf16.vlgmr.msra.gmra.mxu1 %v1286_v6 }
 0xf7a   :  { %v1392_v9 = vpop.f32.mrf.mxu1 }
 0xf7b   :  { %v1393_v10 = vadd.f32 %v1441_v8, %v1392_v9 }
 0xf7c   :  { %v1638_v11 = vpop.f32.mrf.mxu1 }
 0xf7d   :  { %v1399_v13 = vadd.f32 %v1393_v10, %v1999_v7 }
 0xf7e   :  { %v1395_v16 = vpop.f32.mrf.mxu1 }
 0xf7f   :  { %1401 = vst.msk [vmem:[%s2086_s13] sm:$0xff] %vm49_vm0, %v1399_v13  ;;  %v1396_v17 = vadd.f32 %v1441_v8, %v1395_v16 }
 0xf80   :  { %v1639_v18 = vpop.f32.mrf.mxu1 }
 0xf81   :  { %v1400_v0 = vadd.f32 %v1396_v17, %v2004_v12 }
 0xf83   :  { %1402 = vst.msk [vmem:[%s2086_s13 + $0x8] sm:$0xff] %vm49_vm0, %v1400_v0 }

</bundles_post_ra>
